<compile_context>
chip_gen: v6e
topology: v6e:2x2x1
jax: 0.10.0
libtpu: 0.0.40
codegen_flags: <defaults>
</compile_context>

<pallas_src>
import functools

import numpy as np
import jax
import jax.numpy as jnp
from jax import lax
from jax.experimental import pallas as pl
from jax.experimental.pallas import tpu as pltpu


def _roll(v, shift, axis):
    """Cyclic roll, jnp.roll semantics: out[i] = v[i - shift] along `axis`."""
    axis = axis % v.ndim
    size = v.shape[axis]
    return pltpu.roll(v, shift % size, axis)


def _ssb_kernel(x_ref, m_ref, cols_ref, alpha_ref, o_ref, *, W, C):
    # x_ref    : (R, HW)     VMEM  rows = (batch, channel), lanes = flattened (H, W)
    # m_ref    : (6, HW)     VMEM  f32 0/1 lane masks:
    #                          [col_even, row_even, w>=2, w<W-2, h>=2, h<H-2]
    # cols_ref : (R, NCOLS)  VMEM  per-row columns:
    #                          [0:9)        depthwise 3x3 taps * 0.25 (pool folded in)
    #                          [9:9+4C)     fused (pwconv o convT) coeffs, 4 per shift s
    #                          [9+4C:9+5C)  row-select masks for the sublane rotations
    # alpha_ref: (1,)        SMEM  PReLU slope
    # o_ref    : (R, HW)     VMEM  output, already interleaved at full resolution
    R = o_ref.shape[0]
    KOFF = 9
    SOFF = 9 + 4 * C

    col_even = m_ref[0:1, :] > 0.5          # (1, HW) bool : w % 2 == 0  (sub-pixel b=0)
    row_even = m_ref[1:2, :] > 0.5          # (1, HW) bool : h % 2 == 0  (sub-pixel a=0)
    c_ok_m = m_ref[2:3, :]                  # (1, HW) f32  : col offset -2 valid
    c_ok_p = m_ref[3:4, :]                  # (1, HW) f32  : col offset +2 valid
    r_ok_m = m_ref[4:5, :]                  # (1, HW) f32  : row offset -2 valid
    r_ok_p = m_ref[5:6, :]                  # (1, HW) f32  : row offset +2 valid
    alpha = alpha_ref[0]

    cols = cols_ref[...]                    # (R, NCOLS)
    x = x_ref[...]                          # (R, HW) — whole slab, full vregs

    # ---- AvgPool2d(2): 2x2 block sum, replicated over the block (1/4 is in the weights) ----
    cs = x + jnp.where(col_even, _roll(x, -1, -1), _roll(x, 1, -1))
    y = cs + jnp.where(row_even, _roll(cs, -W, -1), _roll(cs, W, -1))

    # ---- depthwise 3x3 on the pooled map == dilation-2 3x3 on the replicated map ----
    cm = c_ok_m * _roll(y, 2, -1)                              # col offset -2 (zero-padded)
    cp = c_ok_p * _roll(y, -2, -1)                             # col offset +2
    w = [cols[:, t:t + 1] for t in range(9)]                   # (R,1) per-row tap weights
    s0 = w[0] * cm + w[1] * y + w[2] * cp                      # row tap -1 (pooled)
    s1 = w[3] * cm + w[4] * y + w[5] * cp                      # row tap  0
    s2 = w[6] * cm + w[7] * y + w[8] * cp                      # row tap +1
    p = r_ok_m * _roll(s0, 2 * W, -1) + s1 + r_ok_p * _roll(s2, -2 * W, -1)
    p = jnp.where(p > 0, p, alpha * p)                         # PReLU

    # ---- fused pointwise 1x1 + ConvTranspose2d(2, stride 2) via sublane rotations ----
    # out[row = b*C+co] = sum_s coef(co, cj=(co+s)%C, parity) * p[row = b*C + (co+s)%C]
    acc = None
    for s in range(C):
        if s == 0:
            src = p
        else:
            p_dn = _roll(p, -s, 0)                             # row r <- p[r + s]
            p_up = _roll(p, C - s, 0)                          # row r <- p[r + s - C]
            sel = cols[:, SOFF + s:SOFF + s + 1] > 0.5         # (R,1): co + s < C ?
            src = jnp.where(sel, p_dn, p_up)
        k = [cols[:, KOFF + 4 * s + q:KOFF + 4 * s + q + 1] for q in range(4)]
        coef = jnp.where(row_even,
                         jnp.where(col_even, k[0], k[1]),      # a=0: (b=0, b=1)
                         jnp.where(col_even, k[2], k[3]))      # a=1: (b=0, b=1)
        term = coef * src
        acc = term if acc is None else acc + term
    o_ref[...] = acc                                           # single lane-dense slab store


def spatial_squeeze_block(x, dw_w, prelu_w, pw_w, up_w):
    """x: (N, C, H, W) f32.  Weights in PyTorch layouts:
       dw_w (C,1,3,3), prelu_w (1,), pw_w (C,C,1,1), up_w (C,C,2,2)."""
    N, C, H, W = x.shape
    assert H % 2 == 0 and W % 2 == 0
    HW = H * W

    # Free layout change only: collapsing a contiguous NCHW array to (N*C, H*W).
    xf = x.astype(jnp.float32).reshape(N * C, HW)

    # Compile-time constant lane masks (parity + dilated-conv border validity).
    hh, ww = np.meshgrid(np.arange(H), np.arange(W), indexing="ij")
    masks = np.stack([
        (ww % 2 == 0),
        (hh % 2 == 0),
        (ww >= 2),
        (ww < W - 2),
        (hh >= 2),
        (hh < H - 2),
    ]).astype(np.float32).reshape(6, HW)
    masks = jnp.asarray(masks)

    # Batch-block size: largest divisor of N fitting a small VMEM budget, with bt*C a
    # multiple of 8 (full sublane occupancy) unless bt covers the whole batch.
    per_item = C * HW * 4
    cands = [b for b in range(1, N + 1)
             if N % b == 0 and b * per_item <= (2 << 20)
             and ((b * C) % 8 == 0 or b == N)]
    bt = max(cands) if cands else N
    R = bt * C
    NCOLS = 9 + 5 * C

    # Weight prep (exact linear algebra, once at trace time):
    #  * fold the AvgPool 1/4 into the depthwise weights,
    #  * fuse the 1x1 pointwise conv into the transposed-conv weights,
    #  * expand everything into per-row (row = (batch-in-block, channel)) columns.
    co = np.arange(R) % C
    dw2 = (0.25 * dw_w.astype(jnp.float32)).reshape(C, 9)
    dwcol = dw2[co]                                                      # (R, 9)

    pw2 = pw_w.reshape(C, C).astype(jnp.float32)
    fused = jnp.einsum("ij,icab->jcab", pw2, up_w.astype(jnp.float32))   # (cin, co, a, b)
    kcols = []
    for s in range(C):
        cj = (co + s) % C
        kcols.append(fused[cj, co].reshape(R, 4))                        # (R, 4), q = 2a+b
    selcol = np.stack([(co < C - s).astype(np.float32) for s in range(C)], axis=1)
    cols = jnp.concatenate([dwcol] + kcols + [jnp.asarray(selcol)], axis=1)  # (R, NCOLS)

    alpha = prelu_w.reshape(1).astype(jnp.float32)

    kernel = functools.partial(_ssb_kernel, W=W, C=C)
    out = pl.pallas_call(
        kernel,
        out_shape=jax.ShapeDtypeStruct((N * C, HW), jnp.float32),
        grid=(N // bt,),
        in_specs=[
            pl.BlockSpec((R, HW), lambda n: (n, 0)),
            pl.BlockSpec((6, HW), lambda n: (0, 0)),
            pl.BlockSpec((R, NCOLS), lambda n: (0, 0)),
            pl.BlockSpec((1,), lambda n: (0,),
                         memory_space=pltpu.MemorySpace.SMEM),
        ],
        out_specs=pl.BlockSpec((R, HW), lambda n: (n, 0)),
        compiler_params=pltpu.CompilerParams(dimension_semantics=("parallel",)),
    )(xf, masks, cols, alpha)

    return out.reshape(N, C, H, W)


def ref_forward(x, dw_w, alpha, pw_w, up_w):
    """Pure-JAX reference matching the PyTorch module semantics."""
    N, C, H, W = x.shape
    y = x.reshape(N, C, H // 2, 2, W // 2, 2).mean(axis=(3, 5))          # AvgPool2d(2)
    y = lax.conv_general_dilated(y, dw_w, (1, 1), ((1, 1), (1, 1)),       # depthwise 3x3
                                 dimension_numbers=('NCHW', 'OIHW', 'NCHW'),
                                 feature_group_count=C)
    y = jnp.where(y > 0, y, alpha * y)                                    # PReLU
    y = lax.conv_general_dilated(y, pw_w, (1, 1), 'VALID',                # pointwise 1x1
                                 dimension_numbers=('NCHW', 'OIHW', 'NCHW'))
    t = jnp.einsum('ncij,cdab->ndiajb', y, up_w)                          # ConvT 2x2 s2
    return t.reshape(N, C, H, W)


if __name__ == "__main__":
    N, C, H, W = 2, 4, 16, 16
    key = jax.random.PRNGKey(0)
    kx, k1, k2, k3 = jax.random.split(key, 4)
    x = jax.random.normal(kx, (N, C, H, W), jnp.float32)
    dw_w = 0.2 * jax.random.normal(k1, (C, 1, 3, 3), jnp.float32)   # dwconv.weight
    prelu_w = jnp.array([0.25], jnp.float32)                        # prelu.weight
    pw_w = 0.2 * jax.random.normal(k2, (C, C, 1, 1), jnp.float32)   # pwconv.weight
    up_w = 0.2 * jax.random.normal(k3, (C, C, 2, 2), jnp.float32)   # upsample.weight

    out = jax.jit(spatial_squeeze_block)(x, dw_w, prelu_w, pw_w, up_w)
    out = jax.block_until_ready(out)

    ref = ref_forward(x, dw_w, 0.25, pw_w, up_w)
    assert out.shape == (N, C, H, W), out.shape
    err = float(jnp.max(jnp.abs(out - ref)))
    assert err < 1e-4, f"max abs error too large: {err}"
    print("KERNEL_OK")
</pallas_src>

<mosaic_0001>
module attributes {stable_mosaic.version = 11 : i64} {
  func.func @_ssb_kernel(%arg0: i32, %arg1: memref<8x256xf32, #tpu.memory_space<vmem>>, %arg2: memref<6x256xf32, #tpu.memory_space<vmem>>, %arg3: memref<8x29xf32, #tpu.memory_space<vmem>>, %arg4: memref<1xf32, #tpu.memory_space<smem>>, %arg5: memref<8x256xf32, #tpu.memory_space<vmem>>) attributes {dimension_semantics = [#tpu.dimension_semantics<parallel>], iteration_bounds = array<i64: 1>, scalar_prefetch = 0 : i64, scratch_operands = 0 : i64, tpu.core_type = #tpu.core_type<tc>, window_params = [{transform_indices = @transform_0, window_bounds = array<i64: 8, 256>}, {pipeline_mode = #tpu.pipeline_mode<synchronous>, transform_indices = @transform_1, window_bounds = array<i64: 6, 256>}, {pipeline_mode = #tpu.pipeline_mode<synchronous>, transform_indices = @transform_2, window_bounds = array<i64: 8, 29>}, {transform_indices = @transform_3, window_bounds = array<i64: 1>}, {transform_indices = @transform_4, window_bounds = array<i64: 8, 256>}]} {
    %c0 = arith.constant 0 : index
    %c0_0 = arith.constant 0 : index
    %0 = vector.load %arg2[%c0, %c0_0] : memref<6x256xf32, #tpu.memory_space<vmem>>, vector<1x256xf32>
    %cst = arith.constant 5.000000e-01 : f32
    %1 = vector.broadcast %cst : f32 to vector<1x256xf32>
    %2 = arith.cmpf ogt, %0, %1 : vector<1x256xf32>
    %c1 = arith.constant 1 : index
    %c0_1 = arith.constant 0 : index
    %3 = vector.load %arg2[%c1, %c0_1] : memref<6x256xf32, #tpu.memory_space<vmem>>, vector<1x256xf32>
    %cst_2 = arith.constant 5.000000e-01 : f32
    %4 = vector.broadcast %cst_2 : f32 to vector<1x256xf32>
    %5 = arith.cmpf ogt, %3, %4 : vector<1x256xf32>
    %c2 = arith.constant 2 : index
    %c0_3 = arith.constant 0 : index
    %6 = vector.load %arg2[%c2, %c0_3] : memref<6x256xf32, #tpu.memory_space<vmem>>, vector<1x256xf32>
    %c3 = arith.constant 3 : index
    %c0_4 = arith.constant 0 : index
    %7 = vector.load %arg2[%c3, %c0_4] : memref<6x256xf32, #tpu.memory_space<vmem>>, vector<1x256xf32>
    %c4 = arith.constant 4 : index
    %c0_5 = arith.constant 0 : index
    %8 = vector.load %arg2[%c4, %c0_5] : memref<6x256xf32, #tpu.memory_space<vmem>>, vector<1x256xf32>
    %c5 = arith.constant 5 : index
    %c0_6 = arith.constant 0 : index
    %9 = vector.load %arg2[%c5, %c0_6] : memref<6x256xf32, #tpu.memory_space<vmem>>, vector<1x256xf32>
    %c0_7 = arith.constant 0 : index
    %10 = memref.load %arg4[%c0_7] : memref<1xf32, #tpu.memory_space<smem>>
    %c0_8 = arith.constant 0 : index
    %c0_9 = arith.constant 0 : index
    %11 = vector.load %arg3[%c0_8, %c0_9] : memref<8x29xf32, #tpu.memory_space<vmem>>, vector<8x29xf32>
    %c0_10 = arith.constant 0 : index
    %c0_11 = arith.constant 0 : index
    %12 = vector.load %arg1[%c0_10, %c0_11] : memref<8x256xf32, #tpu.memory_space<vmem>>, vector<8x256xf32>
    %c255_i32 = arith.constant 255 : i32
    %13 = tpu.dynamic_rotate %12 by %c255_i32 dim 1 : vector<8x256xf32>, i32 -> vector<8x256xf32>
    %c1_i32 = arith.constant 1 : i32
    %14 = tpu.dynamic_rotate %12 by %c1_i32 dim 1 : vector<8x256xf32>, i32 -> vector<8x256xf32>
    %15 = vector.shape_cast %2 : vector<1x256xi1> to vector<1x256xi1>
    %16 = vector.broadcast %15 : vector<1x256xi1> to vector<8x256xi1>
    %17 = arith.select %16, %13, %14 : vector<8x256xi1>, vector<8x256xf32>
    %18 = arith.addf %12, %17 : vector<8x256xf32>
    %c240_i32 = arith.constant 240 : i32
    %19 = tpu.dynamic_rotate %18 by %c240_i32 dim 1 : vector<8x256xf32>, i32 -> vector<8x256xf32>
    %c16_i32 = arith.constant 16 : i32
    %20 = tpu.dynamic_rotate %18 by %c16_i32 dim 1 : vector<8x256xf32>, i32 -> vector<8x256xf32>
    %21 = vector.shape_cast %5 : vector<1x256xi1> to vector<1x256xi1>
    %22 = vector.broadcast %21 : vector<1x256xi1> to vector<8x256xi1>
    %23 = arith.select %22, %19, %20 : vector<8x256xi1>, vector<8x256xf32>
    %24 = arith.addf %18, %23 : vector<8x256xf32>
    %c2_i32 = arith.constant 2 : i32
    %25 = tpu.dynamic_rotate %24 by %c2_i32 dim 1 : vector<8x256xf32>, i32 -> vector<8x256xf32>
    %26 = vector.broadcast %6 : vector<1x256xf32> to vector<8x256xf32>
    %27 = arith.mulf %26, %25 : vector<8x256xf32>
    %c254_i32 = arith.constant 254 : i32
    %28 = tpu.dynamic_rotate %24 by %c254_i32 dim 1 : vector<8x256xf32>, i32 -> vector<8x256xf32>
    %29 = vector.broadcast %7 : vector<1x256xf32> to vector<8x256xf32>
    %30 = arith.mulf %29, %28 : vector<8x256xf32>
    %31 = vector.extract_strided_slice %11 {offsets = [0, 0], sizes = [8, 1], strides = [1, 1]} : vector<8x29xf32> to vector<8x1xf32>
    %32 = vector.extract_strided_slice %11 {offsets = [0, 1], sizes = [8, 1], strides = [1, 1]} : vector<8x29xf32> to vector<8x1xf32>
    %33 = vector.extract_strided_slice %11 {offsets = [0, 2], sizes = [8, 1], strides = [1, 1]} : vector<8x29xf32> to vector<8x1xf32>
    %34 = vector.extract_strided_slice %11 {offsets = [0, 3], sizes = [8, 1], strides = [1, 1]} : vector<8x29xf32> to vector<8x1xf32>
    %35 = vector.extract_strided_slice %11 {offsets = [0, 4], sizes = [8, 1], strides = [1, 1]} : vector<8x29xf32> to vector<8x1xf32>
    %36 = vector.extract_strided_slice %11 {offsets = [0, 5], sizes = [8, 1], strides = [1, 1]} : vector<8x29xf32> to vector<8x1xf32>
    %37 = vector.extract_strided_slice %11 {offsets = [0, 6], sizes = [8, 1], strides = [1, 1]} : vector<8x29xf32> to vector<8x1xf32>
    %38 = vector.extract_strided_slice %11 {offsets = [0, 7], sizes = [8, 1], strides = [1, 1]} : vector<8x29xf32> to vector<8x1xf32>
    %39 = vector.extract_strided_slice %11 {offsets = [0, 8], sizes = [8, 1], strides = [1, 1]} : vector<8x29xf32> to vector<8x1xf32>
    %40 = vector.broadcast %31 : vector<8x1xf32> to vector<8x256xf32>
    %41 = arith.mulf %40, %27 : vector<8x256xf32>
    %42 = vector.broadcast %32 : vector<8x1xf32> to vector<8x256xf32>
    %43 = arith.mulf %42, %24 : vector<8x256xf32>
    %44 = arith.addf %41, %43 : vector<8x256xf32>
    %45 = vector.broadcast %33 : vector<8x1xf32> to vector<8x256xf32>
    %46 = arith.mulf %45, %30 : vector<8x256xf32>
    %47 = arith.addf %44, %46 : vector<8x256xf32>
    %48 = vector.broadcast %34 : vector<8x1xf32> to vector<8x256xf32>
    %49 = arith.mulf %48, %27 : vector<8x256xf32>
    %50 = vector.broadcast %35 : vector<8x1xf32> to vector<8x256xf32>
    %51 = arith.mulf %50, %24 : vector<8x256xf32>
    %52 = arith.addf %49, %51 : vector<8x256xf32>
    %53 = vector.broadcast %36 : vector<8x1xf32> to vector<8x256xf32>
    %54 = arith.mulf %53, %30 : vector<8x256xf32>
    %55 = arith.addf %52, %54 : vector<8x256xf32>
    %56 = vector.broadcast %37 : vector<8x1xf32> to vector<8x256xf32>
    %57 = arith.mulf %56, %27 : vector<8x256xf32>
    %58 = vector.broadcast %38 : vector<8x1xf32> to vector<8x256xf32>
    %59 = arith.mulf %58, %24 : vector<8x256xf32>
    %60 = arith.addf %57, %59 : vector<8x256xf32>
    %61 = vector.broadcast %39 : vector<8x1xf32> to vector<8x256xf32>
    %62 = arith.mulf %61, %30 : vector<8x256xf32>
    %63 = arith.addf %60, %62 : vector<8x256xf32>
    %c32_i32 = arith.constant 32 : i32
    %64 = tpu.dynamic_rotate %47 by %c32_i32 dim 1 : vector<8x256xf32>, i32 -> vector<8x256xf32>
    %65 = vector.broadcast %8 : vector<1x256xf32> to vector<8x256xf32>
    %66 = arith.mulf %65, %64 : vector<8x256xf32>
    %67 = arith.addf %66, %55 : vector<8x256xf32>
    %c224_i32 = arith.constant 224 : i32
    %68 = tpu.dynamic_rotate %63 by %c224_i32 dim 1 : vector<8x256xf32>, i32 -> vector<8x256xf32>
    %69 = vector.broadcast %9 : vector<1x256xf32> to vector<8x256xf32>
    %70 = arith.mulf %69, %68 : vector<8x256xf32>
    %71 = arith.addf %67, %70 : vector<8x256xf32>
    %cst_12 = arith.constant 0.000000e+00 : f32
    %72 = vector.broadcast %cst_12 : f32 to vector<8x256xf32>
    %73 = arith.cmpf ogt, %71, %72 : vector<8x256xf32>
    %74 = vector.broadcast %10 : f32 to vector<8x256xf32>
    %75 = arith.mulf %74, %71 : vector<8x256xf32>
    %76 = arith.select %73, %71, %75 : vector<8x256xi1>, vector<8x256xf32>
    %77 = vector.extract_strided_slice %11 {offsets = [0, 9], sizes = [8, 1], strides = [1, 1]} : vector<8x29xf32> to vector<8x1xf32>
    %78 = vector.extract_strided_slice %11 {offsets = [0, 10], sizes = [8, 1], strides = [1, 1]} : vector<8x29xf32> to vector<8x1xf32>
    %79 = vector.extract_strided_slice %11 {offsets = [0, 11], sizes = [8, 1], strides = [1, 1]} : vector<8x29xf32> to vector<8x1xf32>
    %80 = vector.extract_strided_slice %11 {offsets = [0, 12], sizes = [8, 1], strides = [1, 1]} : vector<8x29xf32> to vector<8x1xf32>
    %81 = vector.shape_cast %2 : vector<1x256xi1> to vector<1x256xi1>
    %82 = vector.broadcast %81 : vector<1x256xi1> to vector<8x256xi1>
    %83 = vector.shape_cast %77 : vector<8x1xf32> to vector<8x1xf32>
    %84 = vector.broadcast %83 : vector<8x1xf32> to vector<8x256xf32>
    %85 = vector.shape_cast %78 : vector<8x1xf32> to vector<8x1xf32>
    %86 = vector.broadcast %85 : vector<8x1xf32> to vector<8x256xf32>
    %87 = arith.select %82, %84, %86 : vector<8x256xi1>, vector<8x256xf32>
    %88 = vector.shape_cast %2 : vector<1x256xi1> to vector<1x256xi1>
    %89 = vector.broadcast %88 : vector<1x256xi1> to vector<8x256xi1>
    %90 = vector.shape_cast %79 : vector<8x1xf32> to vector<8x1xf32>
    %91 = vector.broadcast %90 : vector<8x1xf32> to vector<8x256xf32>
    %92 = vector.shape_cast %80 : vector<8x1xf32> to vector<8x1xf32>
    %93 = vector.broadcast %92 : vector<8x1xf32> to vector<8x256xf32>
    %94 = arith.select %89, %91, %93 : vector<8x256xi1>, vector<8x256xf32>
    %95 = vector.shape_cast %5 : vector<1x256xi1> to vector<1x256xi1>
    %96 = vector.broadcast %95 : vector<1x256xi1> to vector<8x256xi1>
    %97 = arith.select %96, %87, %94 : vector<8x256xi1>, vector<8x256xf32>
    %98 = arith.mulf %97, %76 : vector<8x256xf32>
    %c7_i32 = arith.constant 7 : i32
    %99 = tpu.dynamic_rotate %76 by %c7_i32 dim 0 : vector<8x256xf32>, i32 -> vector<8x256xf32>
    %c3_i32 = arith.constant 3 : i32
    %100 = tpu.dynamic_rotate %76 by %c3_i32 dim 0 : vector<8x256xf32>, i32 -> vector<8x256xf32>
    %101 = vector.extract_strided_slice %11 {offsets = [0, 26], sizes = [8, 1], strides = [1, 1]} : vector<8x29xf32> to vector<8x1xf32>
    %cst_13 = arith.constant 5.000000e-01 : f32
    %102 = vector.broadcast %cst_13 : f32 to vector<8x1xf32>
    %103 = arith.cmpf ogt, %101, %102 : vector<8x1xf32>
    %104 = vector.shape_cast %103 : vector<8x1xi1> to vector<8x1xi1>
    %105 = vector.broadcast %104 : vector<8x1xi1> to vector<8x256xi1>
    %106 = arith.select %105, %99, %100 : vector<8x256xi1>, vector<8x256xf32>
    %107 = vector.extract_strided_slice %11 {offsets = [0, 13], sizes = [8, 1], strides = [1, 1]} : vector<8x29xf32> to vector<8x1xf32>
    %108 = vector.extract_strided_slice %11 {offsets = [0, 14], sizes = [8, 1], strides = [1, 1]} : vector<8x29xf32> to vector<8x1xf32>
    %109 = vector.extract_strided_slice %11 {offsets = [0, 15], sizes = [8, 1], strides = [1, 1]} : vector<8x29xf32> to vector<8x1xf32>
    %110 = vector.extract_strided_slice %11 {offsets = [0, 16], sizes = [8, 1], strides = [1, 1]} : vector<8x29xf32> to vector<8x1xf32>
    %111 = vector.shape_cast %2 : vector<1x256xi1> to vector<1x256xi1>
    %112 = vector.broadcast %111 : vector<1x256xi1> to vector<8x256xi1>
    %113 = vector.shape_cast %107 : vector<8x1xf32> to vector<8x1xf32>
    %114 = vector.broadcast %113 : vector<8x1xf32> to vector<8x256xf32>
    %115 = vector.shape_cast %108 : vector<8x1xf32> to vector<8x1xf32>
    %116 = vector.broadcast %115 : vector<8x1xf32> to vector<8x256xf32>
    %117 = arith.select %112, %114, %116 : vector<8x256xi1>, vector<8x256xf32>
    %118 = vector.shape_cast %2 : vector<1x256xi1> to vector<1x256xi1>
    %119 = vector.broadcast %118 : vector<1x256xi1> to vector<8x256xi1>
    %120 = vector.shape_cast %109 : vector<8x1xf32> to vector<8x1xf32>
    %121 = vector.broadcast %120 : vector<8x1xf32> to vector<8x256xf32>
    %122 = vector.shape_cast %110 : vector<8x1xf32> to vector<8x1xf32>
    %123 = vector.broadcast %122 : vector<8x1xf32> to vector<8x256xf32>
    %124 = arith.select %119, %121, %123 : vector<8x256xi1>, vector<8x256xf32>
    %125 = vector.shape_cast %5 : vector<1x256xi1> to vector<1x256xi1>
    %126 = vector.broadcast %125 : vector<1x256xi1> to vector<8x256xi1>
    %127 = arith.select %126, %117, %124 : vector<8x256xi1>, vector<8x256xf32>
    %128 = arith.mulf %127, %106 : vector<8x256xf32>
    %129 = arith.addf %98, %128 : vector<8x256xf32>
    %c6_i32 = arith.constant 6 : i32
    %130 = tpu.dynamic_rotate %76 by %c6_i32 dim 0 : vector<8x256xf32>, i32 -> vector<8x256xf32>
    %c2_i32_14 = arith.constant 2 : i32
    %131 = tpu.dynamic_rotate %76 by %c2_i32_14 dim 0 : vector<8x256xf32>, i32 -> vector<8x256xf32>
    %132 = vector.extract_strided_slice %11 {offsets = [0, 27], sizes = [8, 1], strides = [1, 1]} : vector<8x29xf32> to vector<8x1xf32>
    %cst_15 = arith.constant 5.000000e-01 : f32
    %133 = vector.broadcast %cst_15 : f32 to vector<8x1xf32>
    %134 = arith.cmpf ogt, %132, %133 : vector<8x1xf32>
    %135 = vector.shape_cast %134 : vector<8x1xi1> to vector<8x1xi1>
    %136 = vector.broadcast %135 : vector<8x1xi1> to vector<8x256xi1>
    %137 = arith.select %136, %130, %131 : vector<8x256xi1>, vector<8x256xf32>
    %138 = vector.extract_strided_slice %11 {offsets = [0, 17], sizes = [8, 1], strides = [1, 1]} : vector<8x29xf32> to vector<8x1xf32>
    %139 = vector.extract_strided_slice %11 {offsets = [0, 18], sizes = [8, 1], strides = [1, 1]} : vector<8x29xf32> to vector<8x1xf32>
    %140 = vector.extract_strided_slice %11 {offsets = [0, 19], sizes = [8, 1], strides = [1, 1]} : vector<8x29xf32> to vector<8x1xf32>
    %141 = vector.extract_strided_slice %11 {offsets = [0, 20], sizes = [8, 1], strides = [1, 1]} : vector<8x29xf32> to vector<8x1xf32>
    %142 = vector.shape_cast %2 : vector<1x256xi1> to vector<1x256xi1>
    %143 = vector.broadcast %142 : vector<1x256xi1> to vector<8x256xi1>
    %144 = vector.shape_cast %138 : vector<8x1xf32> to vector<8x1xf32>
    %145 = vector.broadcast %144 : vector<8x1xf32> to vector<8x256xf32>
    %146 = vector.shape_cast %139 : vector<8x1xf32> to vector<8x1xf32>
    %147 = vector.broadcast %146 : vector<8x1xf32> to vector<8x256xf32>
    %148 = arith.select %143, %145, %147 : vector<8x256xi1>, vector<8x256xf32>
    %149 = vector.shape_cast %2 : vector<1x256xi1> to vector<1x256xi1>
    %150 = vector.broadcast %149 : vector<1x256xi1> to vector<8x256xi1>
    %151 = vector.shape_cast %140 : vector<8x1xf32> to vector<8x1xf32>
    %152 = vector.broadcast %151 : vector<8x1xf32> to vector<8x256xf32>
    %153 = vector.shape_cast %141 : vector<8x1xf32> to vector<8x1xf32>
    %154 = vector.broadcast %153 : vector<8x1xf32> to vector<8x256xf32>
    %155 = arith.select %150, %152, %154 : vector<8x256xi1>, vector<8x256xf32>
    %156 = vector.shape_cast %5 : vector<1x256xi1> to vector<1x256xi1>
    %157 = vector.broadcast %156 : vector<1x256xi1> to vector<8x256xi1>
    %158 = arith.select %157, %148, %155 : vector<8x256xi1>, vector<8x256xf32>
    %159 = arith.mulf %158, %137 : vector<8x256xf32>
    %160 = arith.addf %129, %159 : vector<8x256xf32>
    %c5_i32 = arith.constant 5 : i32
    %161 = tpu.dynamic_rotate %76 by %c5_i32 dim 0 : vector<8x256xf32>, i32 -> vector<8x256xf32>
    %c1_i32_16 = arith.constant 1 : i32
    %162 = tpu.dynamic_rotate %76 by %c1_i32_16 dim 0 : vector<8x256xf32>, i32 -> vector<8x256xf32>
    %163 = vector.extract_strided_slice %11 {offsets = [0, 28], sizes = [8, 1], strides = [1, 1]} : vector<8x29xf32> to vector<8x1xf32>
    %cst_17 = arith.constant 5.000000e-01 : f32
    %164 = vector.broadcast %cst_17 : f32 to vector<8x1xf32>
    %165 = arith.cmpf ogt, %163, %164 : vector<8x1xf32>
    %166 = vector.shape_cast %165 : vector<8x1xi1> to vector<8x1xi1>
    %167 = vector.broadcast %166 : vector<8x1xi1> to vector<8x256xi1>
    %168 = arith.select %167, %161, %162 : vector<8x256xi1>, vector<8x256xf32>
    %169 = vector.extract_strided_slice %11 {offsets = [0, 21], sizes = [8, 1], strides = [1, 1]} : vector<8x29xf32> to vector<8x1xf32>
    %170 = vector.extract_strided_slice %11 {offsets = [0, 22], sizes = [8, 1], strides = [1, 1]} : vector<8x29xf32> to vector<8x1xf32>
    %171 = vector.extract_strided_slice %11 {offsets = [0, 23], sizes = [8, 1], strides = [1, 1]} : vector<8x29xf32> to vector<8x1xf32>
    %172 = vector.extract_strided_slice %11 {offsets = [0, 24], sizes = [8, 1], strides = [1, 1]} : vector<8x29xf32> to vector<8x1xf32>
    %173 = vector.shape_cast %2 : vector<1x256xi1> to vector<1x256xi1>
    %174 = vector.broadcast %173 : vector<1x256xi1> to vector<8x256xi1>
    %175 = vector.shape_cast %169 : vector<8x1xf32> to vector<8x1xf32>
    %176 = vector.broadcast %175 : vector<8x1xf32> to vector<8x256xf32>
    %177 = vector.shape_cast %170 : vector<8x1xf32> to vector<8x1xf32>
    %178 = vector.broadcast %177 : vector<8x1xf32> to vector<8x256xf32>
    %179 = arith.select %174, %176, %178 : vector<8x256xi1>, vector<8x256xf32>
    %180 = vector.shape_cast %2 : vector<1x256xi1> to vector<1x256xi1>
    %181 = vector.broadcast %180 : vector<1x256xi1> to vector<8x256xi1>
    %182 = vector.shape_cast %171 : vector<8x1xf32> to vector<8x1xf32>
    %183 = vector.broadcast %182 : vector<8x1xf32> to vector<8x256xf32>
    %184 = vector.shape_cast %172 : vector<8x1xf32> to vector<8x1xf32>
    %185 = vector.broadcast %184 : vector<8x1xf32> to vector<8x256xf32>
    %186 = arith.select %181, %183, %185 : vector<8x256xi1>, vector<8x256xf32>
    %187 = vector.shape_cast %5 : vector<1x256xi1> to vector<1x256xi1>
    %188 = vector.broadcast %187 : vector<1x256xi1> to vector<8x256xi1>
    %189 = arith.select %188, %179, %186 : vector<8x256xi1>, vector<8x256xf32>
    %190 = arith.mulf %189, %168 : vector<8x256xf32>
    %191 = arith.addf %160, %190 : vector<8x256xf32>
    %c0_18 = arith.constant 0 : index
    %c0_19 = arith.constant 0 : index
    %192 = vector.load %arg5[%c0_18, %c0_19] : memref<8x256xf32, #tpu.memory_space<vmem>>, vector<8x256xf32>
    tpu.vector_store %arg5[%c0_18, %c0_19], %191 {strides = array<i32>} : memref<8x256xf32, #tpu.memory_space<vmem>>, vector<8x256xf32>,
    return
  }
  func.func @transform_0(%arg0: i32) -> (i32, i32) {
    %c0_i32 = arith.constant 0 : i32
    %c0_i32_0 = arith.constant 0 : i32
    return %arg0, %c0_i32 : i32, i32
  }
  func.func @transform_1(%arg0: i32) -> (i32, i32) {
    %c0_i32 = arith.constant 0 : i32
    %c0_i32_0 = arith.constant 0 : i32
    %c0_i32_1 = arith.constant 0 : i32
    return %c0_i32, %c0_i32_0 : i32, i32
  }
  func.func @transform_2(%arg0: i32) -> (i32, i32) {
    %c0_i32 = arith.constant 0 : i32
    %c0_i32_0 = arith.constant 0 : i32
    %c0_i32_1 = arith.constant 0 : i32
    return %c0_i32, %c0_i32_0 : i32, i32
  }
  func.func @transform_3(%arg0: i32) -> i32 {
    %c0_i32 = arith.constant 0 : i32
    %c0_i32_0 = arith.constant 0 : i32
    return %c0_i32 : i32
  }
  func.func @transform_4(%arg0: i32) -> (i32, i32) {
    %c0_i32 = arith.constant 0 : i32
    %c0_i32_0 = arith.constant 0 : i32
    return %arg0, %c0_i32 : i32, i32
  }
}

</mosaic_0001>

<bundles_post_ra>
// kernel: spatial_squeeze_block.1
= control target key start
LH: loop header
LB: loop body
LE: loop exit
PB: predicated region body
PF: predicated region fallthrough
CT: control target
= control target key end

     0   :  { %v462_v1 = vmov 0   ;;  %s463_s17 = smov 1   ;;  %s464_s18 = smov 127   ;;  %v465_v3 = vmov 1   ;;  %v39_v4 = vlaneseq  ;;  %v468_v28 = vmov 2   ;;  %s748_s0 = inlined_call_operand.vmem [shape: f32[8,256], index: 0, kind: input, shape index: {}]   ;;  %s749_s1 = inlined_call_operand.vmem [shape: f32[6,256], index: 1, kind: input, shape index: {}]   ;;  %s750_s2 = inlined_call_operand.vmem [shape: f32[8,29], index: 2, kind: input, shape index: {}]   ;;  %s751_s3 = inlined_call_operand.<no memory space> [shape: f32[1], index: 3, kind: input, shape index: {}]   ;;  %s752_s4 = inlined_call_operand.vmem [shape: f32[8,256], index: 4, kind: output, shape index: {}]  }
   0x1   :  { %v33_v0 = vld [vmem:[%s748_s0] sm:$0xff]  ;;  %434 = vset.pattern.permute.xlu0 %v462_v1  ;;  %v34_v2 = vld [vmem:[%s748_s0 + $0x8] sm:$0xff]  ;;  %435 = vset.pattern.permute.xlu1 %v465_v3  ;;  %s466_s0 = smov 112   ;;  %s467_s23 = smov 16   ;;  %v469_v29 = vmov 6   ;;  %v470_v30 = vmov 7  }
   0x2   :  { %44 = vrot.lane.b32.xlu1 %v33_v0, %s463_s17  ;;  %35 = vrot.lane.b32.xlu0 %v33_v0, %s464_s18  ;;  %v18_v5 = vld [vmem:[%s749_s1] ss:$8 sm:$0x3]  ;;  %v53_v6 = vshrl.u32 %v39_v4, 7  ;;  %v538_v10 = vand.u32 127, %v39_v4  ;;  %v471_v31 = vmov 3  }
   0x3   :  { %vm19_vm0 = vcmp.gt.f32.partialorder %v18_v5, 0.5  ;;  %v559_v27 = vld [vmem:[%s750_s2] sm:$0xff]  ;;  %v472_v32 = vmov 8   ;;  %s473_s27 = smov 2   ;;  %s474_s28 = smov 126   ;;  %v475_v51 = vmov 4  }
   0x4   :  { %v533_v7 = vsub.s32 0, %v53_v6  ;;  %v535_v8 = vsub.s32 1, %v53_v6  ;;  %v51_v9 = vsel %vm19_vm0, 1, %v462_v1  ;;  %vm48_vm1 = vcmp.lt.s32.totalorder %v538_v10, 1  ;;  %s494_s7 = smov 32   ;;  %s495_s8 = smov 96  }
   0x5   :  { %vm41_vm2 = vcmp.lt.s32.totalorder %v538_v10, 127  ;;  %v393_v33 = vld [vmem:[%s749_s1 + $0x1] ss:$8 sm:$0x3]  ;;  %vm70_vm6 = vcmp.lt.s32.totalorder %v538_v10, 112  ;;  %vm77_vm7 = vcmp.lt.s32.totalorder %v538_v10, 16 }
   0x6   :  { %46 = vrot.lane.b32.xlu1 %v34_v2, %s463_s17  ;;  %37 = vrot.lane.b32.xlu0 %v34_v2, %s464_s18  ;;  %v55_v11 = vrot.slane %v51_v9, %v533_v7  ;;  %v59_v12 = vrot.slane %v51_v9, %v535_v8  ;;  %vm22_vm5 = vcmp.gt.f32.partialorder %v393_v33, 0.5  ;;  %v476_v52 = vmov 9  }
   0x7   :  { %v80_v34 = vsel %vm22_vm5, 1, %v462_v1  ;;  %v477_v53 = vmov 5   ;;  %v478_v54 = vmov 12   ;;  %v479_v55 = vmov 10  }
   0x8   :  { %vm544_vm3 = vcmp.eq.s32.totalorder %v55_v11, 1  ;;  %vm548_vm4 = vcmp.eq.s32.totalorder %v59_v12, 1  ;;  %v84_v35 = vrot.slane %v80_v34, %v533_v7  ;;  %v88_v36 = vrot.slane %v80_v34, %v535_v8 }
   0x9   :  { %v480_v56 = vmov 14   ;;  %vm281_vm10 = vcmp.gt.f32.partialorder %v559_v27, 0.5  ;;  %v481_v57 = vmov 11   ;;  %v482_v59 = vmov 27  }
   0xa   :  { %vm574_vm8 = vcmp.eq.s32.totalorder %v84_v35, 1  ;;  %vm578_vm9 = vcmp.eq.s32.totalorder %v88_v36, 1  ;;  %v282_v58 = vsel %vm281_vm10, 1, %v462_v1  ;;  %v483_v60 = vmov 26  }
   0xb   :  { %v484_v61 = vmov 19   ;;  %v485_v62 = vmov 13   ;;  %v486_v63 = vmov 21   ;;  %v488_v1 = vmov 16  }
   0xc   :  { %v490_v3 = vmov 18   ;;  %v491_v4 = vmov 20   ;;  %v492_v5 = vmov 28   ;;  %v493_v6 = vmov 22  }
   0xd   :  { %vm99_vm11 = vcmp.lt.s32.totalorder %v538_v10, 2  ;;  %vm119_vm12 = vcmp.lt.s32.totalorder %v538_v10, 126  ;;  %vm206_vm13 = vcmp.lt.s32.totalorder %v538_v10, 32  ;;  %vm228_vm14 = vcmp.lt.s32.totalorder %v538_v10, 96 }
  0x74   :  { %v45_v13 = vpop.permute.xlu1 %44  ;;  %v36_v14 = vpop.permute.xlu0 %35 }
  0x78   :  { %v47_v17 = vpop.permute.xlu1 %46  ;;  %v38_v18 = vpop.permute.xlu0 %37 }
  0x79   :  { %v49_v19 = vsel %vm48_vm1, %v45_v13, %v47_v17  ;;  %v50_v20 = vsel %vm48_vm1, %v47_v17, %v45_v13  ;;  %v42_v21 = vsel %vm41_vm2, %v36_v14, %v38_v18  ;;  %v43_v22 = vsel %vm41_vm2, %v38_v18, %v36_v14  ;;  %v394_v14 = vld [vmem:[%s749_s1 + $0x2] ss:$8 sm:$0x3] }
  0x7a   :  { %v62_v23 = vsel %vm544_vm3, %v42_v21, %v50_v20  ;;  %v63_v24 = vsel %vm548_vm4, %v43_v22, %v49_v19  ;;  %v106_v18 = vrot.slane %v394_v14, %v533_v7  ;;  %v110_v19 = vrot.slane %v394_v14, %v535_v8  ;;  %v395_v20 = vld [vmem:[%s749_s1 + $0x3] ss:$8 sm:$0x3] }
  0x7b   :  { %v65_v25 = vadd.f32 %v63_v24, %v34_v2  ;;  %v64_v26 = vadd.f32 %v62_v23, %v33_v0  ;;  %v487_v0 = vmov 15   ;;  %v489_v2 = vmov 17  }
  0x7c   :  { %v497_v14 = vmov 24  }
  0x7d   :  { %68 = vrot.lane.b32.xlu1 %v65_v25, %s466_s0  ;;  %66 = vrot.lane.b32.xlu0 %v64_v26, %s466_s0 }
  0x81   :  { %75 = vrot.lane.b32.xlu1 %v65_v25, %s467_s23  ;;  %73 = vrot.lane.b32.xlu0 %v64_v26, %s467_s23 }
  0x85   :  { %143 = vperm.xlu1 %435, %v559_v27   ;;  %137 = vperm.xlu0 %434, %v559_v27  }
  0x89   :  { %436 = vset.pattern.permute.xlu1 %v468_v28  ;;  %437 = vset.pattern.permute.xlu0 %v469_v29  ;;  %v126_v28 = vrot.slane %v395_v20, %v533_v7  ;;  %v130_v29 = vrot.slane %v395_v20, %v535_v8 }
  0x8a   :  { %151 = vperm.xlu1 %436, %v559_v27   ;;  %181 = vperm.xlu0 %437, %v559_v27  }
  0x8e   :  { %438 = vset.pattern.permute.xlu1 %v470_v30  ;;  %440 = vset.pattern.permute.xlu0 %v471_v31 }
  0x8f   :  { %187 = vperm.xlu1 %438, %v559_v27  }
  0x93   :  { %439 = vset.pattern.permute.xlu1 %v472_v32 }
  0xef   :  { %v69_v37 = vpop.permute.xlu1 %68  ;;  %v67_v38 = vpop.permute.xlu0 %66 }
  0xf0   :  { %v71_v43 = vsel %vm70_vm6, %v67_v38, %v69_v37  ;;  %v72_v44 = vsel %vm70_vm6, %v69_v37, %v67_v38 }
  0xf3   :  { %v76_v41 = vpop.permute.xlu1 %75  ;;  %v74_v42 = vpop.permute.xlu0 %73 }
  0xf4   :  { %v78_v45 = vsel %vm77_vm7, %v74_v42, %v76_v41  ;;  %v79_v46 = vsel %vm77_vm7, %v76_v41, %v74_v42 }
  0xf5   :  { %v91_v47 = vsel %vm574_vm8, %v71_v43, %v79_v46  ;;  %v92_v48 = vsel %vm578_vm9, %v72_v44, %v78_v45 }
  0xf6   :  { %v586_v49 = vadd.f32 %v91_v47, %v64_v26  ;;  %v588_v50 = vadd.f32 %v92_v48, %v65_v25 }
  0xf8   :  { %95 = vrot.lane.b32.xlu1 %v586_v49, %s473_s27  ;;  %97 = vrot.lane.b32.xlu0 %v588_v50, %s473_s27 }
  0xfc   :  { %115 = vrot.lane.b32.xlu1 %v586_v49, %s474_s28  ;;  %117 = vrot.lane.b32.xlu0 %v588_v50, %s474_s28 }
 0x100   :  { %195 = vperm.xlu1 %439, %v559_v27   ;;  %159 = vperm.xlu0 %440, %v559_v27   ;;  %v144_v9 = vpop.permute.xlu1 %143  ;;  %v138_v11 = vpop.permute.xlu0 %137 }
 0x101   :  { %v146_v36 = vmul.f32 %v144_v9, %v586_v49  ;;  %v147_v37 = vmul.f32 %v144_v9, %v588_v50 }
 0x104   :  { %441 = vset.pattern.permute.xlu1 %v475_v51  ;;  %443 = vset.pattern.permute.xlu0 %v476_v52 }
 0x105   :  { %165 = vperm.xlu1 %441, %v559_v27   ;;  %254 = vperm.xlu0 %443, %v559_v27   ;;  %v152_v12 = vpop.permute.xlu1 %151  ;;  %v182_v13 = vpop.permute.xlu0 %181 }
 0x109   :  { %442 = vset.pattern.permute.xlu1 %v477_v53  ;;  %446 = vset.pattern.permute.xlu0 %v478_v54 }
 0x10a   :  { %173 = vperm.xlu1 %442, %v559_v27   ;;  %268 = vperm.xlu0 %446, %v559_v27   ;;  %v188_v17 = vpop.permute.xlu1 %187 }
 0x10b   :  { %v190_v52 = vmul.f32 %v188_v17, %v586_v49  ;;  %v191_v53 = vmul.f32 %v188_v17, %v588_v50 }
 0x10e   :  { %444 = vset.pattern.permute.xlu1 %v479_v55  ;;  %449 = vset.pattern.permute.xlu0 %v480_v56 }
 0x10f   :  { %258 = vperm.xlu1 %444, %v559_v27   ;;  %294 = vperm.xlu0 %449, %v559_v27  }
 0x113   :  { %445 = vset.pattern.permute.xlu1 %v481_v57  ;;  %452 = vset.pattern.permute.xlu0 %v482_v59 }
 0x114   :  { %264 = vperm.xlu1 %445, %v559_v27   ;;  %320 = vperm.xlu0 %452, %v282_v58  }
 0x118   :  { %447 = vset.pattern.permute.xlu1 %v483_v60  ;;  %455 = vset.pattern.permute.xlu0 %v484_v61 }
 0x119   :  { %284 = vperm.xlu1 %447, %v282_v58   ;;  %336 = vperm.xlu0 %455, %v559_v27  }
 0x11d   :  { %448 = vset.pattern.permute.xlu1 %v485_v62  ;;  %458 = vset.pattern.permute.xlu0 %v486_v63 }
 0x11e   :  { %290 = vperm.xlu1 %448, %v559_v27  }
 0x122   :  { %450 = vset.pattern.permute.xlu1 %v487_v0 }
 0x123   :  { %300 = vperm.xlu1 %450, %v559_v27  }
 0x127   :  { %451 = vset.pattern.permute.xlu1 %v488_v1 }
 0x128   :  { %304 = vperm.xlu1 %451, %v559_v27  }
 0x12c   :  { %453 = vset.pattern.permute.xlu1 %v489_v2 }
 0x12d   :  { %326 = vperm.xlu1 %453, %v559_v27  }
 0x131   :  { %454 = vset.pattern.permute.xlu1 %v490_v3 }
 0x132   :  { %330 = vperm.xlu1 %454, %v559_v27  }
 0x136   :  { %456 = vset.pattern.permute.xlu1 %v491_v4 }
 0x137   :  { %340 = vperm.xlu1 %456, %v559_v27  }
 0x13b   :  { %457 = vset.pattern.permute.xlu1 %v492_v5 }
 0x13c   :  { %356 = vperm.xlu1 %457, %v282_v58  }
 0x140   :  { %459 = vset.pattern.permute.xlu1 %v493_v6 }
 0x16a   :  { %v96_v21 = vpop.permute.xlu1 %95  ;;  %v98_v22 = vpop.permute.xlu0 %97 }
 0x16b   :  { %v100_v23 = vsel %vm99_vm11, %v96_v21, %v98_v22  ;;  %v101_v24 = vsel %vm99_vm11, %v98_v22, %v96_v21 }
 0x16c   :  { %v113_v25 = vmul.f32 %v106_v18, %v101_v24  ;;  %v114_v26 = vmul.f32 %v110_v19, %v100_v23 }
 0x16e   :  { %v140_v30 = vmul.f32 %v138_v11, %v113_v25  ;;  %v141_v31 = vmul.f32 %v138_v11, %v114_v26  ;;  %v116_v32 = vpop.permute.xlu1 %115  ;;  %v118_v33 = vpop.permute.xlu0 %117  ;;  %v184_v48 = vmul.f32 %v182_v13, %v113_v25  ;;  %v185_v51 = vmul.f32 %v182_v13, %v114_v26 }
 0x16f   :  { %v120_v34 = vsel %vm119_vm12, %v116_v32, %v118_v33  ;;  %v121_v35 = vsel %vm119_vm12, %v118_v33, %v116_v32  ;;  %v496_v13 = vmov 23  }
 0x170   :  { %v133_v38 = vmul.f32 %v126_v28, %v120_v34  ;;  %v134_v41 = vmul.f32 %v130_v29, %v121_v35  ;;  %v149_v42 = vadd.f32 %v147_v37, %v141_v31  ;;  %v148_v44 = vadd.f32 %v146_v36, %v140_v30  ;;  %v396_v30 = vld [vmem:[%s749_s1 + $0x4] ss:$8 sm:$0x3]  ;;  %v397_v37 = vld [vmem:[%s749_s1 + $0x5] ss:$8 sm:$0x3] }
 0x171   :  { %v192_v55 = vadd.f32 %v190_v52, %v184_v48  ;;  %v193_v56 = vadd.f32 %v191_v53, %v185_v51  ;;  %v213_v33 = vrot.slane %v396_v30, %v533_v7  ;;  %v217_v34 = vrot.slane %v396_v30, %v535_v8 }
 0x172   :  { %v155_v43 = vmul.f32 %v152_v12, %v134_v41  ;;  %v154_v45 = vmul.f32 %v152_v12, %v133_v38 }
 0x174   :  { %v157_v46 = vadd.f32 %v155_v43, %v149_v42  ;;  %v156_v47 = vadd.f32 %v154_v45, %v148_v44  ;;  %v235_v42 = vrot.slane %v397_v37, %v533_v7  ;;  %v239_v43 = vrot.slane %v397_v37, %v535_v8 }
 0x176   :  { %204 = vrot.lane.b32.xlu1 %v157_v46, %s494_s7  ;;  %202 = vrot.lane.b32.xlu0 %v156_v47, %s494_s7 }
 0x17b   :  { %v196_v54 = vpop.permute.xlu1 %195  ;;  %v160_v62 = vpop.permute.xlu0 %159 }
 0x17c   :  { %v198_v57 = vmul.f32 %v196_v54, %v133_v38  ;;  %v199_v58 = vmul.f32 %v196_v54, %v134_v41  ;;  %v162_v1 = vmul.f32 %v160_v62, %v113_v25  ;;  %v163_v2 = vmul.f32 %v160_v62, %v114_v26 }
 0x17d   :  { %v248_v54 = vstv %s751_s3 }
 0x17e   :  { %v200_v59 = vadd.f32 %v198_v57, %v192_v55  ;;  %v201_v60 = vadd.f32 %v199_v58, %v193_v56 }
 0x180   :  { %v166_v61 = vpop.permute.xlu1 %165  ;;  %226 = vrot.lane.b32.xlu1 %v201_v60, %s495_s8  ;;  %224 = vrot.lane.b32.xlu0 %v200_v59, %s495_s8  ;;  %v640_v21 = vpop.permute.xlu0 %254 }
 0x181   :  { %v168_v63 = vmul.f32 %v166_v61, %v586_v49  ;;  %v169_v0 = vmul.f32 %v166_v61, %v588_v50 }
 0x183   :  { %v170_v4 = vadd.f32 %v168_v63, %v162_v1  ;;  %v171_v5 = vadd.f32 %v169_v0, %v163_v2 }
 0x184   :  { %366 = vperm.xlu1 %459, %v559_v27   ;;  %362 = vperm.xlu0 %458, %v559_v27  }
 0x185   :  { %v174_v3 = vpop.permute.xlu1 %173  ;;  %v644_v23 = vpop.permute.xlu0 %268 }
 0x186   :  { %v176_v6 = vmul.f32 %v174_v3, %v133_v38  ;;  %v177_v9 = vmul.f32 %v174_v3, %v134_v41 }
 0x188   :  { %v178_v11 = vadd.f32 %v176_v6, %v170_v4  ;;  %v179_v12 = vadd.f32 %v177_v9, %v171_v5  ;;  %460 = vset.pattern.permute.xlu1 %v496_v13  ;;  %461 = vset.pattern.permute.xlu0 %v497_v14 }
 0x189   :  { %372 = vperm.xlu1 %460, %v559_v27   ;;  %376 = vperm.xlu0 %461, %v559_v27  }
 0x18a   :  { %v634_v49 = vpop.permute.xlu1 %258  ;;  %v295_v25 = vpop.permute.xlu0 %294 }
 0x18b   :  { %v261_v8 = vsel %vm544_vm3, %v640_v21, %v634_v49  ;;  %v262_v57 = vsel %vm548_vm4, %v640_v21, %v634_v49 }
 0x18f   :  { %v636_v50 = vpop.permute.xlu1 %264  ;;  %v650_v27 = vpop.permute.xlu0 %320 }
 0x190   :  { %v271_v0 = vsel %vm544_vm3, %v636_v50, %v644_v23  ;;  %v272_v1 = vsel %vm548_vm4, %v636_v50, %v644_v23  ;;  %vm322_vm2 = vcmp.eq.s32.totalorder %v650_v27, 1 }
 0x194   :  { %v638_v17 = vpop.permute.xlu1 %284  ;;  %v654_v29 = vpop.permute.xlu0 %336 }
 0x195   :  { %vm286_vm1 = vcmp.eq.s32.totalorder %v638_v17, 1  ;;  %v274_v17 = vsel %vm578_vm9, %v262_v57, %v272_v1 }
 0x199   :  { %v291_v18 = vpop.permute.xlu1 %290 }
 0x19a   :  { %v297_v58 = vsel %vm544_vm3, %v291_v18, %v295_v25  ;;  %v298_v59 = vsel %vm548_vm4, %v291_v18, %v295_v25  ;;  %v273_v18 = vsel %vm574_vm8, %v261_v8, %v271_v0 }
 0x19e   :  { %v301_v19 = vpop.permute.xlu1 %300 }
 0x1a3   :  { %v305_v20 = vpop.permute.xlu1 %304 }
 0x1a4   :  { %v307_v60 = vsel %vm544_vm3, %v301_v19, %v305_v20  ;;  %v308_v61 = vsel %vm548_vm4, %v301_v19, %v305_v20 }
 0x1a5   :  { %v309_v6 = vsel %vm574_vm8, %v297_v58, %v307_v60  ;;  %v310_v9 = vsel %vm578_vm9, %v298_v59, %v308_v61 }
 0x1a8   :  { %v642_v22 = vpop.permute.xlu1 %326 }
 0x1ad   :  { %v646_v24 = vpop.permute.xlu1 %330 }
 0x1ae   :  { %v333_v25 = vsel %vm544_vm3, %v642_v22, %v646_v24  ;;  %v334_v30 = vsel %vm548_vm4, %v642_v22, %v646_v24 }
 0x1b2   :  { %v648_v26 = vpop.permute.xlu1 %340 }
 0x1b7   :  { %v652_v28 = vpop.permute.xlu1 %356 }
 0x1b8   :  { %vm358_vm5 = vcmp.eq.s32.totalorder %v652_v28, 1 }
 0x1e8   :  { %v205_v31 = vpop.permute.xlu1 %204  ;;  %v203_v32 = vpop.permute.xlu0 %202 }
 0x1e9   :  { %v207_v35 = vsel %vm206_vm13, %v203_v32, %v205_v31  ;;  %v208_v36 = vsel %vm206_vm13, %v205_v31, %v203_v32  ;;  %v343_v31 = vsel %vm544_vm3, %v654_v29, %v648_v26  ;;  %v344_v32 = vsel %vm548_vm4, %v654_v29, %v648_v26 }
 0x1ea   :  { %v220_v38 = vmul.f32 %v213_v33, %v208_v36  ;;  %v221_v41 = vmul.f32 %v217_v34, %v207_v35  ;;  %v346_v26 = vsel %vm578_vm9, %v334_v30, %v344_v32 }
 0x1ec   :  { %v222_v48 = vadd.f32 %v220_v38, %v178_v11  ;;  %v223_v51 = vadd.f32 %v221_v41, %v179_v12  ;;  %v345_v41 = vsel %vm574_vm8, %v333_v25, %v343_v31 }
 0x1f2   :  { %v227_v44 = vpop.permute.xlu1 %226  ;;  %v225_v45 = vpop.permute.xlu0 %224 }
 0x1f3   :  { %v229_v46 = vsel %vm228_vm14, %v225_v45, %v227_v44  ;;  %v230_v47 = vsel %vm228_vm14, %v227_v44, %v225_v45 }
 0x1f4   :  { %v242_v52 = vmul.f32 %v235_v42, %v229_v46  ;;  %v243_v53 = vmul.f32 %v239_v43, %v230_v47 }
 0x1f6   :  { %v244_v55 = vadd.f32 %v242_v52, %v222_v48  ;;  %v245_v10 = vadd.f32 %v243_v53, %v223_v51 }
 0x1f8   :  { %vm246_vm15 = vcmp.gt.f32.partialorder %v244_v55, 0.0  ;;  %vm247_vm0 = vcmp.gt.f32.partialorder %v245_v10, 0.0  ;;  %v249_v56 = vmul.f32 %v248_v54, %v244_v55  ;;  %v250_v7 = vmul.f32 %v248_v54, %v245_v10 }
 0x1fa   :  { %v251_v62 = vsel %vm246_vm15, %v244_v55, %v249_v56  ;;  %v252_v63 = vsel %vm247_vm0, %v245_v10, %v250_v7 }
 0x1fb   :  { %v277_v2 = vrot.slane %v251_v62, 1  ;;  %v278_v3 = vrot.slane %v252_v63, 1  ;;  %v279_v4 = vrot.slane %v251_v62, 5  ;;  %v280_v5 = vrot.slane %v252_v63, 5 }
 0x1fc   :  { %v315_v11 = vrot.slane %v251_v62, 2  ;;  %v316_v12 = vrot.slane %v252_v63, 2  ;;  %v317_v49 = vrot.slane %v251_v62, 6  ;;  %v318_v50 = vrot.slane %v252_v63, 6 }
 0x1fd   :  { %v287_v13 = vsel %vm286_vm1, %v277_v2, %v279_v4  ;;  %v288_v14 = vsel %vm286_vm1, %v278_v3, %v280_v5  ;;  %v275_v33 = vmul.f32 %v273_v18, %v251_v62  ;;  %v276_v34 = vmul.f32 %v274_v17, %v252_v63 }
 0x1fe   :  { %v311_v21 = vmul.f32 %v309_v6, %v287_v13  ;;  %v312_v23 = vmul.f32 %v310_v9, %v288_v14  ;;  %v351_v35 = vrot.slane %v251_v62, 3  ;;  %v352_v36 = vrot.slane %v252_v63, 3 }
 0x1ff   :  { %v367_v19 = vpop.permute.xlu1 %366  ;;  %v363_v20 = vpop.permute.xlu0 %362  ;;  %v323_v37 = vsel %vm322_vm2, %v315_v11, %v317_v49  ;;  %v324_v22 = vsel %vm322_vm2, %v316_v12, %v318_v50  ;;  %v353_v24 = vrot.slane %v251_v62, 7  ;;  %v354_v38 = vrot.slane %v252_v63, 7 }
 0x200   :  { %v313_v42 = vadd.f32 %v311_v21, %v275_v33  ;;  %v314_v43 = vadd.f32 %v312_v23, %v276_v34  ;;  %v369_v29 = vsel %vm544_vm3, %v363_v20, %v367_v19  ;;  %v370_v44 = vsel %vm548_vm4, %v363_v20, %v367_v19 }
 0x201   :  { %v347_v46 = vmul.f32 %v345_v41, %v323_v37  ;;  %v348_v47 = vmul.f32 %v346_v26, %v324_v22  ;;  %v359_v52 = vsel %vm358_vm5, %v351_v35, %v353_v24  ;;  %v360_v53 = vsel %vm358_vm5, %v352_v36, %v354_v38 }
 0x203   :  { %v349_v55 = vadd.f32 %v347_v46, %v313_v42  ;;  %v350_v10 = vadd.f32 %v348_v47, %v314_v43 }
 0x204   :  { %v373_v27 = vpop.permute.xlu1 %372  ;;  %v377_v45 = vpop.permute.xlu0 %376 }
 0x205   :  { %v379_v48 = vsel %vm544_vm3, %v373_v27, %v377_v45  ;;  %v380_v51 = vsel %vm548_vm4, %v373_v27, %v377_v45 }
 0x206   :  { %v381_v28 = vsel %vm574_vm8, %v369_v29, %v379_v48  ;;  %v382_v54 = vsel %vm578_vm9, %v370_v44, %v380_v51 }
 0x207   :  { %v383_v56 = vmul.f32 %v381_v28, %v359_v52  ;;  %v384_v7 = vmul.f32 %v382_v54, %v360_v53 }
 0x209   :  { %v385_v8 = vadd.f32 %v383_v56, %v349_v55  ;;  %v386_v57 = vadd.f32 %v384_v7, %v350_v10 }
 0x20b   :  { %387 = vst [vmem:[%s752_s4] sm:$0xff] %v385_v8  ;;  %388 = vst [vmem:[%s752_s4 + $0x8] sm:$0xff] %v386_v57 }

</bundles_post_ra>
